<compile_context>
chip_gen: v7x
topology: tpu7x:2x2x1
jax: 0.10.0
libtpu: 0.0.40
codegen_flags: <defaults>
</compile_context>

<pallas_src>
import functools

import jax
import jax.numpy as jnp
from jax.experimental import pallas as pl
from jax.experimental.pallas import tpu as pltpu


def _round_up(x, m):
    return ((x + m - 1) // m) * m


def _mlp_fused_kernel(x_ref, *refs, num_weights, compute_dtype):
    """Fused MLP on one batch tile.

    x_ref:            (tile_n, d_in_pad)   activations (compute_dtype, bf16)
    refs[:num_w]:     weights, each (d_in_pad_l, d_out_pad_l), compute_dtype
    refs[num_w]:      (tile_n, d_out_pad)  output
    """
    w_refs = refs[:num_weights]
    o_ref = refs[num_weights]

    h = x_ref[...]  # bf16, fed straight to the MXU
    for li, w_ref in enumerate(w_refs):
        # MXU matmul: bf16 x bf16 -> f32 accumulation.
        y = jnp.dot(h, w_ref[...], preferred_element_type=jnp.float32)
        if li < num_weights - 1:
            # Hidden layer: ReLU; Dropout(p) is identity in eval mode.
            # Keep the carried activation in bf16 (identical w.r.t. the next
            # bf16 matmul; halves the temp footprint).
            h = jnp.maximum(y, 0.0).astype(compute_dtype)
        else:
            # Output head: Sigmoid in f32 (EUP).
            h = jax.nn.sigmoid(y)
    o_ref[...] = h.astype(o_ref.dtype)


def prepare_mlp_params(weights, compute_dtype=jnp.bfloat16):
    """One-time weight prep: cast to bf16 and zero-pad each feature dim up to a
    multiple of 128 (lane-dense, MXU-friendly). Padding is a mathematical
    no-op through the linear layers."""
    dims_in = [w.shape[0] for w in weights]
    dims_out = [w.shape[1] for w in weights]
    for a, b in zip(dims_out[:-1], dims_in[1:]):
        assert a == b, "weight chain mismatch"
    padded = []
    for w in weights:
        dp_in = _round_up(w.shape[0], 128)
        dp_out = _round_up(w.shape[1], 128)
        w = w.astype(compute_dtype)
        if (dp_in, dp_out) != w.shape:
            w = jnp.pad(w, ((0, dp_in - w.shape[0]), (0, dp_out - w.shape[1])))
        padded.append(w)
    return {
        "weights": padded,
        "dim_in": dims_in[0],
        "dim_out": dims_out[-1],
        "compute_dtype": compute_dtype,
    }


def _pick_tile_n(n, max_tile_n):
    tile = _round_up(n, 16)  # 16 rows = one bf16 vreg of sublanes
    if n >= 32:
        # Keep >= 2 grid steps so the "parallel" axis can shard across both
        # TensorCores on v7x.
        tile = min(tile, _round_up((n + 1) // 2, 16))
    return max(16, min(tile, max_tile_n))


def mlp_forward(x, params, *, out_dtype=jnp.float32, max_tile_n=1024,
                single_buffer_weights=True):
    """Apply the fused MLP.  x: [N, dim_in]; params from prepare_mlp_params.

    Returns [N, dim_out] in out_dtype (f32 by default; bf16 is a valid choice
    for a halved output stream with ~3 significant digits after the sigmoid).
    """
    w_padded = params["weights"]
    compute_dtype = params["compute_dtype"]
    d_in, d_out = params["dim_in"], params["dim_out"]
    num_weights = len(w_padded)

    n, d_in_x = x.shape
    assert d_in_x == d_in, (d_in_x, d_in)
    d_in_pad = w_padded[0].shape[0]
    d_out_pad = w_padded[-1].shape[1]

    # --- batch tiling -------------------------------------------------------
    tile_n = _pick_tile_n(n, max_tile_n)
    n_pad = _round_up(n, tile_n)
    grid = (n_pad // tile_n,)

    # --- bf16 activation stream; pad only if actually needed ----------------
    if x.dtype != compute_dtype:
        x = x.astype(compute_dtype)
    if (n_pad, d_in_pad) != (n, d_in):
        x = jnp.pad(x, ((0, n_pad - n), (0, d_in_pad - d_in)))

    kernel = functools.partial(
        _mlp_fused_kernel, num_weights=num_weights, compute_dtype=compute_dtype
    )

    itemsize_c = jnp.dtype(compute_dtype).itemsize
    itemsize_o = jnp.dtype(out_dtype).itemsize
    w_bytes = sum(int(w.size) * itemsize_c for w in w_padded)
    max_hidden = max(w.shape[1] for w in w_padded)

    # Advisory cost estimate (bytes reflect the bf16 streams).
    flops = 2 * n_pad * sum(w.shape[0] * w.shape[1] for w in w_padded)
    cost = pl.CostEstimate(
        flops=flops,
        transcendentals=n_pad * d_out_pad,  # sigmoid exp
        bytes_accessed=(n_pad * d_in_pad * itemsize_c
                        + w_bytes
                        + n_pad * d_out_pad * itemsize_o),
    )

    # Explicit VMEM budget (v7x: 64 MiB physical, 32 MiB default scoped).
    vmem_needed = (
        2 * tile_n * d_in_pad * itemsize_c        # double-buffered input tile
        + 2 * tile_n * d_out_pad * itemsize_o     # double-buffered output tile
        + 2 * w_bytes                             # weights (worst case 2 bufs)
        + tile_n * max_hidden * (4 + itemsize_c)  # f32 accum + bf16 hidden temp
    )
    vmem_limit = int(min(max(2 * vmem_needed, 16 << 20), 64 << 20))

    x_spec = pl.BlockSpec((tile_n, d_in_pad), lambda i: (i, 0))
    out_spec = pl.BlockSpec((tile_n, d_out_pad), lambda i: (i, 0))

    def make_weight_specs(pipeline_mode):
        if pipeline_mode is None:
            return [pl.BlockSpec(w.shape, lambda i: (0, 0)) for w in w_padded]
        return [pl.BlockSpec(w.shape, lambda i: (0, 0),
                             pipeline_mode=pipeline_mode) for w in w_padded]

    def call(w_specs):
        return pl.pallas_call(
            kernel,
            out_shape=jax.ShapeDtypeStruct((n_pad, d_out_pad), out_dtype),
            grid_spec=pltpu.PrefetchScalarGridSpec(
                num_scalar_prefetch=0,
                grid=grid,
                in_specs=[x_spec] + w_specs,
                out_specs=out_spec,
            ),
            compiler_params=pltpu.CompilerParams(
                dimension_semantics=("parallel",),
                vmem_limit_bytes=vmem_limit,
            ),
            cost_estimate=cost,
        )(x, *w_padded)

    if single_buffer_weights:
        # Constant-index weights never change block; single-buffering halves
        # their VMEM footprint (matters on v7x's 64 MiB VMEM for big
        # dim_inner). Fall back gracefully if this build rejects Buffered(1).
        try:
            return call(make_weight_specs(pl.Buffered(1)))[:n, :d_out]
        except Exception:
            pass
    return call(make_weight_specs(None))[:n, :d_out]


def init_mlp_params(key, dim_in, dim_out, dim_inner, num_layers):
    """Weights matching the module's shapes (PyTorch-style uniform init).

    Stored as [d_in, d_out] (transposed vs nn.Linear); all bias=False.
    Returned in f32; cast/pad once with prepare_mlp_params.
    """
    dim_inner = dim_in if dim_inner is None else dim_inner
    weights = []
    if num_layers > 1:
        d_in = dim_in
        for _ in range(num_layers - 1):
            key, sub = jax.random.split(key)
            bound = 1.0 / (d_in ** 0.5)
            weights.append(jax.random.uniform(
                sub, (d_in, dim_inner), jnp.float32, minval=-bound, maxval=bound))
            d_in = dim_inner
        key, sub = jax.random.split(key)
        bound = 1.0 / (dim_inner ** 0.5)
        weights.append(jax.random.uniform(
            sub, (dim_inner, dim_out), jnp.float32, minval=-bound, maxval=bound))
    else:
        key, sub = jax.random.split(key)
        bound = 1.0 / (dim_in ** 0.5)
        weights.append(jax.random.uniform(
            sub, (dim_in, dim_out), jnp.float32, minval=-bound, maxval=bound))
    return weights


def mlp_reference(x, weights, compute_dtype=jnp.bfloat16):
    """Pure-JAX reference with identical numerics (bf16 matmul, f32 accum,
    bf16 hidden carry)."""
    h = x.astype(compute_dtype)
    for w in weights[:-1]:
        y = jnp.dot(h, w.astype(compute_dtype), preferred_element_type=jnp.float32)
        h = jax.nn.relu(y).astype(compute_dtype)
    y = jnp.dot(h, weights[-1].astype(compute_dtype),
                preferred_element_type=jnp.float32)
    return jax.nn.sigmoid(y)


if __name__ == "__main__":
    # Small, module-consistent shapes.
    batch = 8
    dim_in = 32
    dim_inner = 32
    dim_out = 16
    num_layers = 3
    p = 0.1  # dropout prob (identity in eval mode)

    key = jax.random.PRNGKey(0)
    key_x, key_w = jax.random.split(key)
    x = jax.random.normal(key_x, (batch, dim_in), jnp.float32)

    weights = init_mlp_params(key_w, dim_in, dim_out, dim_inner, num_layers)
    params = prepare_mlp_params(weights)          # one-time pad + bf16 cast

    out = jax.block_until_ready(mlp_forward(x, params))

    ref = mlp_reference(x, weights)
    assert out.shape == (batch, dim_out)
    assert jnp.allclose(out, ref, atol=2e-3, rtol=1e-3), (
        float(jnp.max(jnp.abs(out - ref))))

    print("KERNEL_OK")
</pallas_src>

<mosaic_0001>
module attributes {stable_mosaic.version = 11 : i64} {
  func.func @_mlp_fused_kernel(%arg0: i32, %arg1: memref<16x128xbf16, #tpu.memory_space<vmem>>, %arg2: memref<128x128xbf16, #tpu.memory_space<vmem>>, %arg3: memref<128x128xbf16, #tpu.memory_space<vmem>>, %arg4: memref<128x128xbf16, #tpu.memory_space<vmem>>, %arg5: memref<16x128xf32, #tpu.memory_space<vmem>>) attributes {dimension_semantics = [#tpu.dimension_semantics<parallel>], iteration_bounds = array<i64: 1>, scalar_prefetch = 0 : i64, scratch_operands = 0 : i64, tpu.core_type = #tpu.core_type<tc>, window_params = [{transform_indices = @transform_0, window_bounds = array<i64: 16, 128>}, {pipeline_mode = #tpu.pipeline_mode<synchronous>, transform_indices = @transform_1, window_bounds = array<i64: 128, 128>}, {pipeline_mode = #tpu.pipeline_mode<synchronous>, transform_indices = @transform_2, window_bounds = array<i64: 128, 128>}, {pipeline_mode = #tpu.pipeline_mode<synchronous>, transform_indices = @transform_3, window_bounds = array<i64: 128, 128>}, {transform_indices = @transform_4, window_bounds = array<i64: 16, 128>}]} {
    %c0 = arith.constant 0 : index
    %c0_0 = arith.constant 0 : index
    %0 = vector.load %arg1[%c0, %c0_0] : memref<16x128xbf16, #tpu.memory_space<vmem>>, vector<16x128xbf16>
    %c0_1 = arith.constant 0 : index
    %c0_2 = arith.constant 0 : index
    %1 = vector.load %arg2[%c0_1, %c0_2] : memref<128x128xbf16, #tpu.memory_space<vmem>>, vector<128x128xbf16>
    %cst = arith.constant dense<0.000000e+00> : vector<16x128xf32>
    %2 = tpu.matmul %0, %1, %cst {dimension_numbers = #tpu.dot_dimension_numbers<[1], [0], [0], [1], [0, 0, 1, 1], [], []>} : vector<16x128xbf16>, vector<128x128xbf16>, vector<16x128xf32> -> vector<16x128xf32>
    %cst_3 = arith.constant 0.000000e+00 : f32
    %3 = vector.broadcast %cst_3 : f32 to vector<16x128xf32>
    %4 = arith.maximumf %2, %3 : vector<16x128xf32>
    %5 = arith.truncf %4 : vector<16x128xf32> to vector<16x128xbf16>
    %c0_4 = arith.constant 0 : index
    %c0_5 = arith.constant 0 : index
    %6 = vector.load %arg3[%c0_4, %c0_5] : memref<128x128xbf16, #tpu.memory_space<vmem>>, vector<128x128xbf16>
    %cst_6 = arith.constant dense<0.000000e+00> : vector<16x128xf32>
    %7 = tpu.matmul %5, %6, %cst_6 {dimension_numbers = #tpu.dot_dimension_numbers<[1], [0], [0], [1], [0, 0, 1, 1], [], []>} : vector<16x128xbf16>, vector<128x128xbf16>, vector<16x128xf32> -> vector<16x128xf32>
    %cst_7 = arith.constant 0.000000e+00 : f32
    %8 = vector.broadcast %cst_7 : f32 to vector<16x128xf32>
    %9 = arith.maximumf %7, %8 : vector<16x128xf32>
    %10 = arith.truncf %9 : vector<16x128xf32> to vector<16x128xbf16>
    %c0_8 = arith.constant 0 : index
    %c0_9 = arith.constant 0 : index
    %11 = vector.load %arg4[%c0_8, %c0_9] : memref<128x128xbf16, #tpu.memory_space<vmem>>, vector<128x128xbf16>
    %cst_10 = arith.constant dense<0.000000e+00> : vector<16x128xf32>
    %12 = tpu.matmul %10, %11, %cst_10 {dimension_numbers = #tpu.dot_dimension_numbers<[1], [0], [0], [1], [0, 0, 1, 1], [], []>} : vector<16x128xbf16>, vector<128x128xbf16>, vector<16x128xf32> -> vector<16x128xf32>
    %13 = arith.negf %12 : vector<16x128xf32>
    %14 = math.exp %13 : vector<16x128xf32>
    %cst_11 = arith.constant 1.000000e+00 : f32
    %15 = vector.broadcast %cst_11 : f32 to vector<16x128xf32>
    %16 = arith.addf %15, %14 : vector<16x128xf32>
    %17 = arith.divf %15, %16 : vector<16x128xf32>
    %c0_12 = arith.constant 0 : index
    %c0_13 = arith.constant 0 : index
    %18 = vector.load %arg5[%c0_12, %c0_13] : memref<16x128xf32, #tpu.memory_space<vmem>>, vector<16x128xf32>
    tpu.vector_store %arg5[%c0_12, %c0_13], %17 {strides = array<i32>} : memref<16x128xf32, #tpu.memory_space<vmem>>, vector<16x128xf32>,
    return
  }
  func.func @transform_0(%arg0: i32) -> (i32, i32) {
    %c0_i32 = arith.constant 0 : i32
    %c0_i32_0 = arith.constant 0 : i32
    return %arg0, %c0_i32 : i32, i32
  }
  func.func @transform_1(%arg0: i32) -> (i32, i32) {
    %c0_i32 = arith.constant 0 : i32
    %c0_i32_0 = arith.constant 0 : i32
    %c0_i32_1 = arith.constant 0 : i32
    return %c0_i32, %c0_i32_0 : i32, i32
  }
  func.func @transform_2(%arg0: i32) -> (i32, i32) {
    %c0_i32 = arith.constant 0 : i32
    %c0_i32_0 = arith.constant 0 : i32
    %c0_i32_1 = arith.constant 0 : i32
    return %c0_i32, %c0_i32_0 : i32, i32
  }
  func.func @transform_3(%arg0: i32) -> (i32, i32) {
    %c0_i32 = arith.constant 0 : i32
    %c0_i32_0 = arith.constant 0 : i32
    %c0_i32_1 = arith.constant 0 : i32
    return %c0_i32, %c0_i32_0 : i32, i32
  }
  func.func @transform_4(%arg0: i32) -> (i32, i32) {
    %c0_i32 = arith.constant 0 : i32
    %c0_i32_0 = arith.constant 0 : i32
    return %arg0, %c0_i32 : i32, i32
  }
}

module attributes {stable_mosaic.version = 11 : i64} {
  func.func @_mlp_fused_kernel(%arg0: i32, %arg1: memref<16x128xbf16, #tpu.memory_space<vmem>>, %arg2: memref<128x128xbf16, #tpu.memory_space<vmem>>, %arg3: memref<128x128xbf16, #tpu.memory_space<vmem>>, %arg4: memref<128x128xbf16, #tpu.memory_space<vmem>>, %arg5: memref<16x128xf32, #tpu.memory_space<vmem>>) attributes {dimension_semantics = [#tpu.dimension_semantics<parallel>], iteration_bounds = array<i64: 1>, scalar_prefetch = 0 : i64, scratch_operands = 0 : i64, tpu.core_type = #tpu.core_type<tc>, window_params = [{transform_indices = @transform_0, window_bounds = array<i64: 16, 128>}, {pipeline_mode = #tpu.pipeline_mode<synchronous>, transform_indices = @transform_1, window_bounds = array<i64: 128, 128>}, {pipeline_mode = #tpu.pipeline_mode<synchronous>, transform_indices = @transform_2, window_bounds = array<i64: 128, 128>}, {pipeline_mode = #tpu.pipeline_mode<synchronous>, transform_indices = @transform_3, window_bounds = array<i64: 128, 128>}, {transform_indices = @transform_4, window_bounds = array<i64: 16, 128>}]} {
    %c0 = arith.constant 0 : index
    %c0_0 = arith.constant 0 : index
    %0 = vector.load %arg1[%c0, %c0_0] : memref<16x128xbf16, #tpu.memory_space<vmem>>, vector<16x128xbf16>
    %c0_1 = arith.constant 0 : index
    %c0_2 = arith.constant 0 : index
    %1 = vector.load %arg2[%c0_1, %c0_2] : memref<128x128xbf16, #tpu.memory_space<vmem>>, vector<128x128xbf16>
    %cst = arith.constant dense<0.000000e+00> : vector<16x128xf32>
    %2 = tpu.matmul %0, %1, %cst {dimension_numbers = #tpu.dot_dimension_numbers<[1], [0], [0], [1], [0, 0, 1, 1], [], []>} : vector<16x128xbf16>, vector<128x128xbf16>, vector<16x128xf32> -> vector<16x128xf32>
    %cst_3 = arith.constant 0.000000e+00 : f32
    %3 = vector.broadcast %cst_3 : f32 to vector<16x128xf32>
    %4 = arith.maximumf %2, %3 : vector<16x128xf32>
    %5 = arith.truncf %4 : vector<16x128xf32> to vector<16x128xbf16>
    %c0_4 = arith.constant 0 : index
    %c0_5 = arith.constant 0 : index
    %6 = vector.load %arg3[%c0_4, %c0_5] : memref<128x128xbf16, #tpu.memory_space<vmem>>, vector<128x128xbf16>
    %cst_6 = arith.constant dense<0.000000e+00> : vector<16x128xf32>
    %7 = tpu.matmul %5, %6, %cst_6 {dimension_numbers = #tpu.dot_dimension_numbers<[1], [0], [0], [1], [0, 0, 1, 1], [], []>} : vector<16x128xbf16>, vector<128x128xbf16>, vector<16x128xf32> -> vector<16x128xf32>
    %cst_7 = arith.constant 0.000000e+00 : f32
    %8 = vector.broadcast %cst_7 : f32 to vector<16x128xf32>
    %9 = arith.maximumf %7, %8 : vector<16x128xf32>
    %10 = arith.truncf %9 : vector<16x128xf32> to vector<16x128xbf16>
    %c0_8 = arith.constant 0 : index
    %c0_9 = arith.constant 0 : index
    %11 = vector.load %arg4[%c0_8, %c0_9] : memref<128x128xbf16, #tpu.memory_space<vmem>>, vector<128x128xbf16>
    %cst_10 = arith.constant dense<0.000000e+00> : vector<16x128xf32>
    %12 = tpu.matmul %10, %11, %cst_10 {dimension_numbers = #tpu.dot_dimension_numbers<[1], [0], [0], [1], [0, 0, 1, 1], [], []>} : vector<16x128xbf16>, vector<128x128xbf16>, vector<16x128xf32> -> vector<16x128xf32>
    %13 = arith.negf %12 : vector<16x128xf32>
    %14 = math.exp %13 : vector<16x128xf32>
    %cst_11 = arith.constant 1.000000e+00 : f32
    %15 = vector.broadcast %cst_11 : f32 to vector<16x128xf32>
    %16 = arith.addf %15, %14 : vector<16x128xf32>
    %17 = arith.divf %15, %16 : vector<16x128xf32>
    %c0_12 = arith.constant 0 : index
    %c0_13 = arith.constant 0 : index
    %18 = vector.load %arg5[%c0_12, %c0_13] : memref<16x128xf32, #tpu.memory_space<vmem>>, vector<16x128xf32>
    tpu.vector_store %arg5[%c0_12, %c0_13], %17 {strides = array<i32>} : memref<16x128xf32, #tpu.memory_space<vmem>>, vector<16x128xf32>,
    return
  }
  func.func @transform_0(%arg0: i32) -> (i32, i32) {
    %c0_i32 = arith.constant 0 : i32
    %c0_i32_0 = arith.constant 0 : i32
    return %arg0, %c0_i32 : i32, i32
  }
  func.func @transform_1(%arg0: i32) -> (i32, i32) {
    %c0_i32 = arith.constant 0 : i32
    %c0_i32_0 = arith.constant 0 : i32
    %c0_i32_1 = arith.constant 0 : i32
    return %c0_i32, %c0_i32_0 : i32, i32
  }
  func.func @transform_2(%arg0: i32) -> (i32, i32) {
    %c0_i32 = arith.constant 0 : i32
    %c0_i32_0 = arith.constant 0 : i32
    %c0_i32_1 = arith.constant 0 : i32
    return %c0_i32, %c0_i32_0 : i32, i32
  }
  func.func @transform_3(%arg0: i32) -> (i32, i32) {
    %c0_i32 = arith.constant 0 : i32
    %c0_i32_0 = arith.constant 0 : i32
    %c0_i32_1 = arith.constant 0 : i32
    return %c0_i32, %c0_i32_0 : i32, i32
  }
  func.func @transform_4(%arg0: i32) -> (i32, i32) {
    %c0_i32 = arith.constant 0 : i32
    %c0_i32_0 = arith.constant 0 : i32
    return %arg0, %c0_i32 : i32, i32
  }
}

</mosaic_0001>

<bundles_post_ra>
// kernel: tpu_custom_call.1
= control target key start
LH: loop header
LB: loop body
LE: loop exit
PB: predicated region body
PF: predicated region fallthrough
CT: control target
= control target key end

     0   :  { %9 = vsyncpa [#allocation3], 0  ;;  %s864_s0 = inlined_call_operand.hbm [shape: bf16[16,128], index: 0, kind: input, shape index: {}]   ;;  %s865_s1 = inlined_call_operand.hbm [shape: bf16[128,128], index: 1, kind: input, shape index: {}]   ;;  %s866_s2 = inlined_call_operand.hbm [shape: bf16[128,128], index: 2, kind: input, shape index: {}]   ;;  %s867_s3 = inlined_call_operand.hbm [shape: bf16[128,128], index: 3, kind: input, shape index: {}]   ;;  %s868_s4 = inlined_call_operand.hbm [shape: f32[16,128], index: 4, kind: output, shape index: {}]  }
   0x1   :  { %10 = vsyncpa [#allocation6], 0 }
   0x2   :  { %11 = vsyncpa [#allocation9], 0 }
   0x3   :  { %12 = vsyncpa [#allocation4], 0  ;;  %s712_s15 = smov [#allocation5]   ;;  %s713_s17 = smov [#allocation2]  }
   0x4   :  { %s30_s16 = sshll.u32 %s712_s15, 4  ;;  %s18_s18 = sshll.u32 %s713_s17, 4  ;;  %s31_s16 = int_to_ptr.vmem [resolvable:$true] %s30_s16  ;;  %s748_s18 = int_to_ptr.vmem [resolvable:$true] %s18_s18 }
   0x5   :  { %s594_s21 = scalar_lea.hbm %s865_s1, 1024 }
   0x6   :  { %p595_p0 = scmp.ne.s32.totalorder %s865_s1, %s594_s21  ;;  %p598_p1 = scmp.lt.u32.totalorder %s594_s21, %s865_s1 }
   0x8   :  { %p600_p2 = pnand %p598_p1, %p595_p0 }
   0xa   :  { %603 = shalt.err (!%p600_p2)
}
   0xb   :  { %s604_s26 = scalar_lea.vmem %s31_s16, 1024  ;;  %p609_p4 = scmp.lt.s32.totalorder %s31_s16, %s31_s16 }
   0xc   :  { %p605_p3 = scmp.ne.s32.totalorder %s31_s16, %s604_s26  ;;  %p610_p5 = scmp.lt.s32.totalorder %s604_s26, %s604_s26 }
   0xe   :  { %p611_p6 = por %p610_p5, %p609_p4 }
  0x10   :  { %p612_p7 = pnand %p611_p6, %p605_p3 }
  0x12   :  { %615 = shalt.err (!%p612_p7)
}
  0x13   :  { %s714_s27 = smov 64   ;;  %s715_s28 = smov 4  }
  0x14   :  { %36 = dma.hbm_to_vmem [thread:$0]  %s865_s1, 1024, %s31_s16, [#allocation6], %s714_s27, %s714_s27, %s715_s28  }
  0x15   :  { %s616_s7 = scalar_lea.hbm %s864_s0, 128 }
  0x16   :  { %p617_p8 = scmp.ne.s32.totalorder %s864_s0, %s616_s7  ;;  %p620_p9 = scmp.lt.u32.totalorder %s616_s7, %s864_s0 }
  0x18   :  { %p622_p10 = pnand %p620_p9, %p617_p8 }
  0x1a   :  { %625 = shalt.err (!%p622_p10)
}
  0x1b   :  { %s626_s12 = scalar_lea.vmem %s748_s18, 128  ;;  %p631_p12 = scmp.lt.s32.totalorder %s748_s18, %s748_s18 }
  0x1c   :  { %p627_p11 = scmp.ne.s32.totalorder %s748_s18, %s626_s12  ;;  %p632_p13 = scmp.lt.s32.totalorder %s626_s12, %s626_s12 }
  0x1e   :  { %p633_p0 = por %p632_p13, %p631_p12 }
  0x20   :  { %p634_p1 = pnand %p633_p0, %p627_p11 }
  0x22   :  { %637 = shalt.err (!%p634_p1)
}
  0x23   :  { %24 = dma.hbm_to_vmem [thread:$0]  %s864_s0, 128, %s748_s18, [#allocation3], %s714_s27, %s714_s27, %s715_s28  }
  0x24   :  { %s716_s14 = smov [#allocation7]   ;;  %s717_s16 = smov [#allocation8]  }
  0x25   :  { %s42_s15 = sshll.u32 %s716_s14, 4  ;;  %s54_s17 = sshll.u32 %s717_s16, 4  ;;  %s43_s15 = int_to_ptr.vmem [resolvable:$true] %s42_s15  ;;  %s785_s17 = int_to_ptr.vmem [resolvable:$true] %s54_s17 }
  0x26   :  { %s638_s21 = scalar_lea.hbm %s866_s2, 1024 }
  0x27   :  { %p639_p2 = scmp.ne.s32.totalorder %s866_s2, %s638_s21  ;;  %p642_p3 = scmp.lt.u32.totalorder %s638_s21, %s866_s2 }
  0x29   :  { %p644_p4 = pnand %p642_p3, %p639_p2 }
  0x2b   :  { %647 = shalt.err (!%p644_p4)
}
  0x2c   :  { %s648_s0 = scalar_lea.vmem %s43_s15, 1024  ;;  %p653_p6 = scmp.lt.s32.totalorder %s43_s15, %s43_s15 }
  0x2d   :  { %p649_p5 = scmp.ne.s32.totalorder %s43_s15, %s648_s0  ;;  %p654_p7 = scmp.lt.s32.totalorder %s648_s0, %s648_s0 }
  0x2f   :  { %p655_p8 = por %p654_p7, %p653_p6 }
  0x31   :  { %p656_p9 = pnand %p655_p8, %p649_p5 }
  0x33   :  { %659 = shalt.err (!%p656_p9)
}
  0x34   :  { %48 = dma.hbm_to_vmem [thread:$0]  %s866_s2, 1024, %s43_s15, [#allocation6], %s714_s27, %s714_s27, %s715_s28  }
  0x35   :  { %s660_s5 = scalar_lea.hbm %s867_s3, 1024 }
  0x36   :  { %p661_p10 = scmp.ne.s32.totalorder %s867_s3, %s660_s5  ;;  %p664_p11 = scmp.lt.u32.totalorder %s660_s5, %s867_s3 }
  0x38   :  { %p666_p12 = pnand %p664_p11, %p661_p10 }
  0x3a   :  { %669 = shalt.err (!%p666_p12)
}
  0x3b   :  { %s670_s10 = scalar_lea.vmem %s785_s17, 1024  ;;  %p675_p0 = scmp.lt.s32.totalorder %s785_s17, %s785_s17 }
  0x3c   :  { %p671_p13 = scmp.ne.s32.totalorder %s785_s17, %s670_s10  ;;  %p676_p1 = scmp.lt.s32.totalorder %s670_s10, %s670_s10 }
  0x3e   :  { %p677_p2 = por %p676_p1, %p675_p0 }
  0x40   :  { %p678_p3 = pnand %p677_p2, %p671_p13 }
  0x42   :  { %681 = shalt.err (!%p678_p3)
}
  0x43   :  { %60 = dma.hbm_to_vmem [thread:$0]  %s867_s3, 1024, %s785_s17, [#allocation9], %s714_s27, %s714_s27, %s715_s28  }
  0x44   :  { %704 = dma.done.wait [#allocation3], 128  }
  0x45   :  { %705 = vsyncadd [#allocation3], 4294967168 }
  0x46   :  { %706 = dma.done.wait [#allocation6], 2048  }
  0x47   :  { %707 = vsyncadd [#allocation6], 4294965248 }
  0x48   :  { %708 = dma.done.wait [#allocation9], 1024  }
  0x49   :  { %709 = vsyncadd [#allocation9], 4294966272  ;;  %v718_v0 = vmov 0.0   ;;  %vm719_vm0 = vmmov 0   ;;  %v561_v1 = vld [vmem:[#allocation5] sm:$0xff]   ;;  %v562_v2 = vld [vmem:[#allocation5 + $0x8] sm:$0xff]  }
  0x4a   :  { %490 = vmatprep.subr.bf16.mxu0 %v718_v0  ;;  %506 = vmatprep.mubr.msk.bf16.mxu0 %vm719_vm0, %v718_v0  ;;  %v563_v3 = vld [vmem:[#allocation5 + $0x10] sm:$0xff]   ;;  %v570_v4 = vld [vmem:[#allocation7] sm:$0xff]   ;;  %v564_v5 = vld [vmem:[#allocation5 + $0x18] sm:$0xff]   ;;  %s720_s3 = smov [#allocation10]  }
  0x4b   :  { %510 = vmatprep.subr.bf16.mxu1 %v718_v0  ;;  %526 = vmatprep.mubr.msk.bf16.mxu1 %vm719_vm0, %v718_v0  ;;  %v571_v6 = vld [vmem:[#allocation7 + $0x8] sm:$0xff]   ;;  %v565_v7 = vld [vmem:[#allocation5 + $0x20] sm:$0xff]   ;;  %v572_v8 = vld [vmem:[#allocation7 + $0x10] sm:$0xff]   ;;  %s422_s27 = sshll.u32 %s720_s3, 4  ;;  %s423_s27 = int_to_ptr.vmem [resolvable:$true] %s422_s27 }
  0x4c   :  { %491 = vmatpush3.bf16.msra.mxu0 %v561_v1  ;;  %511 = vmatpush3.bf16.msra.mxu1 %v570_v4  ;;  %v566_v9 = vld [vmem:[#allocation5 + $0x28] sm:$0xff]   ;;  %v573_v10 = vld [vmem:[#allocation7 + $0x18] sm:$0xff]   ;;  %v567_v11 = vld [vmem:[#allocation5 + $0x30] sm:$0xff]   ;;  %s682_s28 = scalar_lea.vmem %s423_s27, 256  ;;  %p687_p5 = scmp.lt.s32.totalorder %s423_s27, %s423_s27 }
  0x4d   :  { %492 = vmatprep.subr.bf16.mxu0 %v718_v0  ;;  %512 = vmatprep.subr.bf16.mxu1 %v718_v0  ;;  %v574_v12 = vld [vmem:[#allocation7 + $0x20] sm:$0xff]   ;;  %v568_v13 = vld [vmem:[#allocation5 + $0x38] sm:$0xff]   ;;  %v575_v14 = vld [vmem:[#allocation7 + $0x28] sm:$0xff]   ;;  %p683_p4 = scmp.ne.s32.totalorder %s423_s27, %s682_s28  ;;  %p688_p6 = scmp.lt.s32.totalorder %s682_s28, %s682_s28 }
  0x4e   :  { %v569_v15 = vld [vmem:[#allocation2] sm:$0xff]   ;;  %v576_v16 = vld [vmem:[#allocation7 + $0x30] sm:$0xff]   ;;  %v578_v18 = vld [vmem:[#allocation8] sm:$0xff]  }
  0x4f   :  { %v577_v17 = vld [vmem:[#allocation7 + $0x38] sm:$0xff]   ;;  %v579_v19 = vld [vmem:[#allocation8 + $0x8] sm:$0xff]   ;;  %v580_v20 = vld [vmem:[#allocation8 + $0x10] sm:$0xff]   ;;  %p689_p7 = por %p688_p6, %p687_p5 }
  0x50   :  { %493 = vmatpush3.bf16.msra.mxu0 %v562_v2  ;;  %513 = vmatpush3.bf16.msra.mxu1 %v571_v6  ;;  %v581_v21 = vld [vmem:[#allocation8 + $0x18] sm:$0xff]   ;;  %v582_v22 = vld [vmem:[#allocation8 + $0x20] sm:$0xff]   ;;  %v583_v23 = vld [vmem:[#allocation8 + $0x28] sm:$0xff]  }
  0x51   :  { %494 = vmatprep.subr.bf16.mxu0 %v718_v0  ;;  %514 = vmatprep.subr.bf16.mxu1 %v718_v0  ;;  %v584_v31 = vld [vmem:[#allocation8 + $0x30] sm:$0xff]   ;;  %v585_v32 = vld [vmem:[#allocation8 + $0x38] sm:$0xff]   ;;  %p690_p8 = pnand %p689_p7, %p683_p4 }
  0x54   :  { %495 = vmatpush3.bf16.msra.mxu0 %v563_v3  ;;  %515 = vmatpush3.bf16.msra.mxu1 %v572_v8 }
  0x55   :  { %496 = vmatprep.subr.bf16.mxu0 %v718_v0  ;;  %516 = vmatprep.subr.bf16.mxu1 %v718_v0 }
  0x58   :  { %497 = vmatpush3.bf16.msra.mxu0 %v564_v5  ;;  %517 = vmatpush3.bf16.msra.mxu1 %v573_v10 }
  0x59   :  { %498 = vmatprep.subr.bf16.mxu0 %v718_v0  ;;  %518 = vmatprep.subr.bf16.mxu1 %v718_v0 }
  0x5c   :  { %499 = vmatpush3.bf16.msra.mxu0 %v565_v7  ;;  %519 = vmatpush3.bf16.msra.mxu1 %v574_v12 }
  0x5d   :  { %500 = vmatprep.subr.bf16.mxu0 %v718_v0  ;;  %520 = vmatprep.subr.bf16.mxu1 %v718_v0 }
  0x60   :  { %501 = vmatpush3.bf16.msra.mxu0 %v566_v9  ;;  %521 = vmatpush3.bf16.msra.mxu1 %v575_v14 }
  0x61   :  { %502 = vmatprep.subr.bf16.mxu0 %v718_v0  ;;  %522 = vmatprep.subr.bf16.mxu1 %v718_v0 }
  0x64   :  { %503 = vmatpush3.bf16.msra.mxu0 %v567_v11  ;;  %523 = vmatpush3.bf16.msra.mxu1 %v576_v16 }
  0x65   :  { %504 = vmatprep.subr.bf16.mxu0 %v718_v0  ;;  %524 = vmatprep.subr.bf16.mxu1 %v718_v0 }
  0x68   :  { %505 = vmatpush3.bf16.msra.mxu0 %v568_v13  ;;  %525 = vmatpush3.bf16.msra.mxu1 %v577_v17 }
  0x69   :  { %530 = vmatprep.subr.bf16.mxu0 %v718_v0 }
  0x6b   :  { %507 = vmatmul.mubr.bf16.vlgmr.msra.gmra.mrb[0].mxu0 %v569_v15 }
  0x6c   :  { %546 = vmatprep.mubr.msk.bf16.mxu0 %vm719_vm0, %v718_v0  ;;  %531 = vmatpush3.bf16.msra.mxu0 %v578_v18 }
  0x6d   :  { %532 = vmatprep.subr.bf16.mxu0 %v718_v0 }
  0x70   :  { %533 = vmatpush3.bf16.msra.mxu0 %v579_v19 }
  0x71   :  { %534 = vmatprep.subr.bf16.mxu0 %v718_v0 }
  0x74   :  { %535 = vmatpush3.bf16.msra.mxu0 %v580_v20 }
  0x75   :  { %536 = vmatprep.subr.bf16.mxu0 %v718_v0 }
  0x78   :  { %537 = vmatpush3.bf16.msra.mxu0 %v581_v21 }
  0x79   :  { %538 = vmatprep.subr.bf16.mxu0 %v718_v0 }
  0x7c   :  { %539 = vmatpush3.bf16.msra.mxu0 %v582_v22 }
  0x7d   :  { %540 = vmatprep.subr.bf16.mxu0 %v718_v0 }
  0x80   :  { %541 = vmatpush3.bf16.msra.mxu0 %v583_v23 }
  0x81   :  { %542 = vmatprep.subr.bf16.mxu0 %v718_v0 }
  0x84   :  { %543 = vmatpush3.bf16.msra.mxu0 %v584_v31 }
  0x85   :  { %544 = vmatprep.subr.bf16.mxu0 %v718_v0 }
  0x88   :  { %545 = vmatpush3.bf16.msra.mxu0 %v585_v32 }
 0x13e   :  { %v180_v24 = vpop.f32.mrb[0].mxu0 }
 0x13f   :  { %v508_v25 = vpop.f32.mrb[1].mxu0  ;;  %v187_v27 = vmax.f32 %v180_v24, 0.0 }
 0x140   :  { %v183_v26 = vpop.f32.mrb[2].mxu0 }
 0x141   :  { %v188_v28 = vmax.f32 %v183_v26, 0.0  ;;  %v509_v29 = vpop.f32.mrb[3].mxu0 }
 0x143   :  { %v189_v30 = vpack.c.bf16 %v188_v28, %v187_v27 }
 0x145   :  { %527 = vmatmul.mubr.bf16.vlgmr.msra.gmra.mrb[0].mxu1 %v189_v30 }
 0x218   :  { %v288_v33 = vpop.f32.mrb[0].mxu1 }
 0x219   :  { %v528_v34 = vpop.f32.mrb[1].mxu1  ;;  %v295_v36 = vmax.f32 %v288_v33, 0.0 }
 0x21a   :  { %v291_v35 = vpop.f32.mrb[2].mxu1 }
 0x21b   :  { %v296_v37 = vmax.f32 %v291_v35, 0.0  ;;  %v529_v38 = vpop.f32.mrb[3].mxu1 }
 0x21d   :  { %v297_v39 = vpack.c.bf16 %v296_v37, %v295_v36 }
 0x21f   :  { %547 = vmatmul.mubr.bf16.vlgmr.msra.gmra.mrb[4].mxu0 %v297_v39 }
 0x2f2   :  { %v396_v40 = vpop.f32.mrb[4].mxu0 }
 0x2f3   :  { %v461_v41 = vmul.f32 -1.442695, %v396_v40  ;;  %v548_v42 = vpop.f32.mrb[5].mxu0 }
 0x2f4   :  { %v399_v43 = vpop.f32.mrb[6].mxu0 }
 0x2f5   :  { %586 = vpow2.f32 %v461_v41  ;;  %v462_v44 = vmul.f32 -1.442695, %v399_v43  ;;  %v549_v45 = vpop.f32.mrb[7].mxu0 }
 0x2f7   :  { %588 = vpow2.f32 %v462_v44 }
 0x2ff   :  { %v587_v46 = vpop.eup %586 }
 0x300   :  { %v409_v47 = vadd.f32 1.0, %v587_v46 }
 0x301   :  { %v589_v48 = vpop.eup %588 }
 0x302   :  { %590 = vrcp.f32 %v409_v47  ;;  %v410_v49 = vadd.f32 1.0, %v589_v48 }
 0x304   :  { %592 = vrcp.f32 %v410_v49 }
 0x30c   :  { %v591_v50 = vpop.eup %590 }
 0x30d   :  { %415 = vst [vmem:[#allocation10] sm:$0xff] %v591_v50 }
 0x30e   :  { %v593_v51 = vpop.eup %592 }
 0x30f   :  { %416 = vst [vmem:[#allocation10 + $0x8] sm:$0xff] %v593_v51 }
 0x310   :  { %693 = shalt.err (!%p690_p8)
}
 0x311   :  { %s694_s13 = scalar_lea.hbm %s868_s4, 256 }
 0x312   :  { %p695_p9 = scmp.ne.s32.totalorder %s868_s4, %s694_s13  ;;  %p698_p10 = scmp.lt.u32.totalorder %s694_s13, %s868_s4 }
 0x314   :  { %p700_p11 = pnand %p698_p10, %p695_p9 }
 0x316   :  { %703 = shalt.err (!%p700_p11)
}
 0x317   :  { %s721_s19 = smov 128   ;;  %s722_s20 = smov 8  }
 0x318   :  { %428 = dma.vmem_to_hbm [thread:$0]  %s423_s27, 256, %s868_s4, [#allocation4], %s721_s19, %s721_s19, %s722_s20  }
 0x319   :  { %710 = dma.done.wait [#allocation4], 256  }
 0x31a   :  { %711 = vsyncadd [#allocation4], 4294967040 }
 0x31b   :  { %432 = vsyncpa [#allocation3], 1 }
 0x31c   :  { %433 = vsyncpa [#allocation6], 1 }
 0x31d   :  { %434 = vsyncpa [#allocation9], 1 }
 0x31e   :  { %435 = vsyncpa [#allocation4], 1 }

// kernel: tpu_custom_call.1
= control target key start
LH: loop header
LB: loop body
LE: loop exit
PB: predicated region body
PF: predicated region fallthrough
CT: control target
= control target key end

     0   :  { %9 = vsyncpa [#allocation3], 0  ;;  %s864_s0 = inlined_call_operand.hbm [shape: bf16[16,128], index: 0, kind: input, shape index: {}]   ;;  %s865_s1 = inlined_call_operand.hbm [shape: bf16[128,128], index: 1, kind: input, shape index: {}]   ;;  %s866_s2 = inlined_call_operand.hbm [shape: bf16[128,128], index: 2, kind: input, shape index: {}]   ;;  %s867_s3 = inlined_call_operand.hbm [shape: bf16[128,128], index: 3, kind: input, shape index: {}]   ;;  %s868_s4 = inlined_call_operand.hbm [shape: f32[16,128], index: 4, kind: output, shape index: {}]  }
   0x1   :  { %10 = vsyncpa [#allocation6], 0 }
   0x2   :  { %11 = vsyncpa [#allocation9], 0 }
   0x3   :  { %12 = vsyncpa [#allocation4], 0  ;;  %s712_s15 = smov [#allocation5]   ;;  %s713_s17 = smov [#allocation2]  }
   0x4   :  { %s30_s16 = sshll.u32 %s712_s15, 4  ;;  %s18_s18 = sshll.u32 %s713_s17, 4  ;;  %s31_s16 = int_to_ptr.vmem [resolvable:$true] %s30_s16  ;;  %s748_s18 = int_to_ptr.vmem [resolvable:$true] %s18_s18 }
   0x5   :  { %s594_s21 = scalar_lea.hbm %s865_s1, 1024 }
   0x6   :  { %p595_p0 = scmp.ne.s32.totalorder %s865_s1, %s594_s21  ;;  %p598_p1 = scmp.lt.u32.totalorder %s594_s21, %s865_s1 }
   0x8   :  { %p600_p2 = pnand %p598_p1, %p595_p0 }
   0xa   :  { %603 = shalt.err (!%p600_p2)
}
   0xb   :  { %s604_s26 = scalar_lea.vmem %s31_s16, 1024  ;;  %p609_p4 = scmp.lt.s32.totalorder %s31_s16, %s31_s16 }
   0xc   :  { %p605_p3 = scmp.ne.s32.totalorder %s31_s16, %s604_s26  ;;  %p610_p5 = scmp.lt.s32.totalorder %s604_s26, %s604_s26 }
   0xe   :  { %p611_p6 = por %p610_p5, %p609_p4 }
  0x10   :  { %p612_p7 = pnand %p611_p6, %p605_p3 }
  0x12   :  { %615 = shalt.err (!%p612_p7)
}
  0x13   :  { %s714_s27 = smov 64   ;;  %s715_s28 = smov 4  }
  0x14   :  { %36 = dma.hbm_to_vmem [thread:$0]  %s865_s1, 1024, %s31_s16, [#allocation6], %s714_s27, %s714_s27, %s715_s28  }
  0x15   :  { %s616_s7 = scalar_lea.hbm %s864_s0, 128 }
  0x16   :  { %p617_p8 = scmp.ne.s32.totalorder %s864_s0, %s616_s7  ;;  %p620_p9 = scmp.lt.u32.totalorder %s616_s7, %s864_s0 }
  0x18   :  { %p622_p10 = pnand %p620_p9, %p617_p8 }
  0x1a   :  { %625 = shalt.err (!%p622_p10)
}
  0x1b   :  { %s626_s12 = scalar_lea.vmem %s748_s18, 128  ;;  %p631_p12 = scmp.lt.s32.totalorder %s748_s18, %s748_s18 }
  0x1c   :  { %p627_p11 = scmp.ne.s32.totalorder %s748_s18, %s626_s12  ;;  %p632_p13 = scmp.lt.s32.totalorder %s626_s12, %s626_s12 }
  0x1e   :  { %p633_p0 = por %p632_p13, %p631_p12 }
  0x20   :  { %p634_p1 = pnand %p633_p0, %p627_p11 }
  0x22   :  { %637 = shalt.err (!%p634_p1)
}
  0x23   :  { %24 = dma.hbm_to_vmem [thread:$0]  %s864_s0, 128, %s748_s18, [#allocation3], %s714_s27, %s714_s27, %s715_s28  }
  0x24   :  { %s716_s14 = smov [#allocation7]   ;;  %s717_s16 = smov [#allocation8]  }
  0x25   :  { %s42_s15 = sshll.u32 %s716_s14, 4  ;;  %s54_s17 = sshll.u32 %s717_s16, 4  ;;  %s43_s15 = int_to_ptr.vmem [resolvable:$true] %s42_s15  ;;  %s785_s17 = int_to_ptr.vmem [resolvable:$true] %s54_s17 }
  0x26   :  { %s638_s21 = scalar_lea.hbm %s866_s2, 1024 }
  0x27   :  { %p639_p2 = scmp.ne.s32.totalorder %s866_s2, %s638_s21  ;;  %p642_p3 = scmp.lt.u32.totalorder %s638_s21, %s866_s2 }
  0x29   :  { %p644_p4 = pnand %p642_p3, %p639_p2 }
  0x2b   :  { %647 = shalt.err (!%p644_p4)
}
  0x2c   :  { %s648_s0 = scalar_lea.vmem %s43_s15, 1024  ;;  %p653_p6 = scmp.lt.s32.totalorder %s43_s15, %s43_s15 }
  0x2d   :  { %p649_p5 = scmp.ne.s32.totalorder %s43_s15, %s648_s0  ;;  %p654_p7 = scmp.lt.s32.totalorder %s648_s0, %s648_s0 }
  0x2f   :  { %p655_p8 = por %p654_p7, %p653_p6 }
  0x31   :  { %p656_p9 = pnand %p655_p8, %p649_p5 }
  0x33   :  { %659 = shalt.err (!%p656_p9)
}
  0x34   :  { %48 = dma.hbm_to_vmem [thread:$0]  %s866_s2, 1024, %s43_s15, [#allocation6], %s714_s27, %s714_s27, %s715_s28  }
  0x35   :  { %s660_s5 = scalar_lea.hbm %s867_s3, 1024 }
  0x36   :  { %p661_p10 = scmp.ne.s32.totalorder %s867_s3, %s660_s5  ;;  %p664_p11 = scmp.lt.u32.totalorder %s660_s5, %s867_s3 }
  0x38   :  { %p666_p12 = pnand %p664_p11, %p661_p10 }
  0x3a   :  { %669 = shalt.err (!%p666_p12)
}
  0x3b   :  { %s670_s10 = scalar_lea.vmem %s785_s17, 1024  ;;  %p675_p0 = scmp.lt.s32.totalorder %s785_s17, %s785_s17 }
  0x3c   :  { %p671_p13 = scmp.ne.s32.totalorder %s785_s17, %s670_s10  ;;  %p676_p1 = scmp.lt.s32.totalorder %s670_s10, %s670_s10 }
  0x3e   :  { %p677_p2 = por %p676_p1, %p675_p0 }
  0x40   :  { %p678_p3 = pnand %p677_p2, %p671_p13 }
  0x42   :  { %681 = shalt.err (!%p678_p3)
}
  0x43   :  { %60 = dma.hbm_to_vmem [thread:$0]  %s867_s3, 1024, %s785_s17, [#allocation9], %s714_s27, %s714_s27, %s715_s28  }
  0x44   :  { %704 = dma.done.wait [#allocation3], 128  }
  0x45   :  { %705 = vsyncadd [#allocation3], 4294967168 }
  0x46   :  { %706 = dma.done.wait [#allocation6], 2048  }
  0x47   :  { %707 = vsyncadd [#allocation6], 4294965248 }
  0x48   :  { %708 = dma.done.wait [#allocation9], 1024  }
  0x49   :  { %709 = vsyncadd [#allocation9], 4294966272  ;;  %v718_v0 = vmov 0.0   ;;  %vm719_vm0 = vmmov 0   ;;  %v561_v1 = vld [vmem:[#allocation5] sm:$0xff]   ;;  %v562_v2 = vld [vmem:[#allocation5 + $0x8] sm:$0xff]  }
  0x4a   :  { %490 = vmatprep.subr.bf16.mxu0 %v718_v0  ;;  %506 = vmatprep.mubr.msk.bf16.mxu0 %vm719_vm0, %v718_v0  ;;  %v563_v3 = vld [vmem:[#allocation5 + $0x10] sm:$0xff]   ;;  %v570_v4 = vld [vmem:[#allocation7] sm:$0xff]   ;;  %v564_v5 = vld [vmem:[#allocation5 + $0x18] sm:$0xff]   ;;  %s720_s3 = smov [#allocation10]  }
  0x4b   :  { %510 = vmatprep.subr.bf16.mxu1 %v718_v0  ;;  %526 = vmatprep.mubr.msk.bf16.mxu1 %vm719_vm0, %v718_v0  ;;  %v571_v6 = vld [vmem:[#allocation7 + $0x8] sm:$0xff]   ;;  %v565_v7 = vld [vmem:[#allocation5 + $0x20] sm:$0xff]   ;;  %v572_v8 = vld [vmem:[#allocation7 + $0x10] sm:$0xff]   ;;  %s422_s27 = sshll.u32 %s720_s3, 4  ;;  %s423_s27 = int_to_ptr.vmem [resolvable:$true] %s422_s27 }
  0x4c   :  { %491 = vmatpush3.bf16.msra.mxu0 %v561_v1  ;;  %511 = vmatpush3.bf16.msra.mxu1 %v570_v4  ;;  %v566_v9 = vld [vmem:[#allocation5 + $0x28] sm:$0xff]   ;;  %v573_v10 = vld [vmem:[#allocation7 + $0x18] sm:$0xff]   ;;  %v567_v11 = vld [vmem:[#allocation5 + $0x30] sm:$0xff]   ;;  %s682_s28 = scalar_lea.vmem %s423_s27, 256  ;;  %p687_p5 = scmp.lt.s32.totalorder %s423_s27, %s423_s27 }
  0x4d   :  { %492 = vmatprep.subr.bf16.mxu0 %v718_v0  ;;  %512 = vmatprep.subr.bf16.mxu1 %v718_v0  ;;  %v574_v12 = vld [vmem:[#allocation7 + $0x20] sm:$0xff]   ;;  %v568_v13 = vld [vmem:[#allocation5 + $0x38] sm:$0xff]   ;;  %v575_v14 = vld [vmem:[#allocation7 + $0x28] sm:$0xff]   ;;  %p683_p4 = scmp.ne.s32.totalorder %s423_s27, %s682_s28  ;;  %p688_p6 = scmp.lt.s32.totalorder %s682_s28, %s682_s28 }
  0x4e   :  { %v569_v15 = vld [vmem:[#allocation2] sm:$0xff]   ;;  %v576_v16 = vld [vmem:[#allocation7 + $0x30] sm:$0xff]   ;;  %v578_v18 = vld [vmem:[#allocation8] sm:$0xff]  }
  0x4f   :  { %v577_v17 = vld [vmem:[#allocation7 + $0x38] sm:$0xff]   ;;  %v579_v19 = vld [vmem:[#allocation8 + $0x8] sm:$0xff]   ;;  %v580_v20 = vld [vmem:[#allocation8 + $0x10] sm:$0xff]   ;;  %p689_p7 = por %p688_p6, %p687_p5 }
  0x50   :  { %493 = vmatpush3.bf16.msra.mxu0 %v562_v2  ;;  %513 = vmatpush3.bf16.msra.mxu1 %v571_v6  ;;  %v581_v21 = vld [vmem:[#allocation8 + $0x18] sm:$0xff]   ;;  %v582_v22 = vld [vmem:[#allocation8 + $0x20] sm:$0xff]   ;;  %v583_v23 = vld [vmem:[#allocation8 + $0x28] sm:$0xff]  }
  0x51   :  { %494 = vmatprep.subr.bf16.mxu0 %v718_v0  ;;  %514 = vmatprep.subr.bf16.mxu1 %v718_v0  ;;  %v584_v31 = vld [vmem:[#allocation8 + $0x30] sm:$0xff]   ;;  %v585_v32 = vld [vmem:[#allocation8 + $0x38] sm:$0xff]   ;;  %p690_p8 = pnand %p689_p7, %p683_p4 }
  0x54   :  { %495 = vmatpush3.bf16.msra.mxu0 %v563_v3  ;;  %515 = vmatpush3.bf16.msra.mxu1 %v572_v8 }
  0x55   :  { %496 = vmatprep.subr.bf16.mxu0 %v718_v0  ;;  %516 = vmatprep.subr.bf16.mxu1 %v718_v0 }
  0x58   :  { %497 = vmatpush3.bf16.msra.mxu0 %v564_v5  ;;  %517 = vmatpush3.bf16.msra.mxu1 %v573_v10 }
  0x59   :  { %498 = vmatprep.subr.bf16.mxu0 %v718_v0  ;;  %518 = vmatprep.subr.bf16.mxu1 %v718_v0 }
  0x5c   :  { %499 = vmatpush3.bf16.msra.mxu0 %v565_v7  ;;  %519 = vmatpush3.bf16.msra.mxu1 %v574_v12 }
  0x5d   :  { %500 = vmatprep.subr.bf16.mxu0 %v718_v0  ;;  %520 = vmatprep.subr.bf16.mxu1 %v718_v0 }
  0x60   :  { %501 = vmatpush3.bf16.msra.mxu0 %v566_v9  ;;  %521 = vmatpush3.bf16.msra.mxu1 %v575_v14 }
  0x61   :  { %502 = vmatprep.subr.bf16.mxu0 %v718_v0  ;;  %522 = vmatprep.subr.bf16.mxu1 %v718_v0 }
  0x64   :  { %503 = vmatpush3.bf16.msra.mxu0 %v567_v11  ;;  %523 = vmatpush3.bf16.msra.mxu1 %v576_v16 }
  0x65   :  { %504 = vmatprep.subr.bf16.mxu0 %v718_v0  ;;  %524 = vmatprep.subr.bf16.mxu1 %v718_v0 }
  0x68   :  { %505 = vmatpush3.bf16.msra.mxu0 %v568_v13  ;;  %525 = vmatpush3.bf16.msra.mxu1 %v577_v17 }
  0x69   :  { %530 = vmatprep.subr.bf16.mxu0 %v718_v0 }
  0x6b   :  { %507 = vmatmul.mubr.bf16.vlgmr.msra.gmra.mrb[0].mxu0 %v569_v15 }
  0x6c   :  { %546 = vmatprep.mubr.msk.bf16.mxu0 %vm719_vm0, %v718_v0  ;;  %531 = vmatpush3.bf16.msra.mxu0 %v578_v18 }
  0x6d   :  { %532 = vmatprep.subr.bf16.mxu0 %v718_v0 }
  0x70   :  { %533 = vmatpush3.bf16.msra.mxu0 %v579_v19 }
  0x71   :  { %534 = vmatprep.subr.bf16.mxu0 %v718_v0 }
  0x74   :  { %535 = vmatpush3.bf16.msra.mxu0 %v580_v20 }
  0x75   :  { %536 = vmatprep.subr.bf16.mxu0 %v718_v0 }
  0x78   :  { %537 = vmatpush3.bf16.msra.mxu0 %v581_v21 }
  0x79   :  { %538 = vmatprep.subr.bf16.mxu0 %v718_v0 }
  0x7c   :  { %539 = vmatpush3.bf16.msra.mxu0 %v582_v22 }
  0x7d   :  { %540 = vmatprep.subr.bf16.mxu0 %v718_v0 }
  0x80   :  { %541 = vmatpush3.bf16.msra.mxu0 %v583_v23 }
  0x81   :  { %542 = vmatprep.subr.bf16.mxu0 %v718_v0 }
  0x84   :  { %543 = vmatpush3.bf16.msra.mxu0 %v584_v31 }
  0x85   :  { %544 = vmatprep.subr.bf16.mxu0 %v718_v0 }
  0x88   :  { %545 = vmatpush3.bf16.msra.mxu0 %v585_v32 }
 0x13e   :  { %v180_v24 = vpop.f32.mrb[0].mxu0 }
 0x13f   :  { %v508_v25 = vpop.f32.mrb[1].mxu0  ;;  %v187_v27 = vmax.f32 %v180_v24, 0.0 }
 0x140   :  { %v183_v26 = vpop.f32.mrb[2].mxu0 }
 0x141   :  { %v188_v28 = vmax.f32 %v183_v26, 0.0  ;;  %v509_v29 = vpop.f32.mrb[3].mxu0 }
 0x143   :  { %v189_v30 = vpack.c.bf16 %v188_v28, %v187_v27 }
 0x145   :  { %527 = vmatmul.mubr.bf16.vlgmr.msra.gmra.mrb[0].mxu1 %v189_v30 }
 0x218   :  { %v288_v33 = vpop.f32.mrb[0].mxu1 }
 0x219   :  { %v528_v34 = vpop.f32.mrb[1].mxu1  ;;  %v295_v36 = vmax.f32 %v288_v33, 0.0 }
 0x21a   :  { %v291_v35 = vpop.f32.mrb[2].mxu1 }
 0x21b   :  { %v296_v37 = vmax.f32 %v291_v35, 0.0  ;;  %v529_v38 = vpop.f32.mrb[3].mxu1 }
 0x21d   :  { %v297_v39 = vpack.c.bf16 %v296_v37, %v295_v36 }
 0x21f   :  { %547 = vmatmul.mubr.bf16.vlgmr.msra.gmra.mrb[4].mxu0 %v297_v39 }
 0x2f2   :  { %v396_v40 = vpop.f32.mrb[4].mxu0 }
 0x2f3   :  { %v461_v41 = vmul.f32 -1.442695, %v396_v40  ;;  %v548_v42 = vpop.f32.mrb[5].mxu0 }
 0x2f4   :  { %v399_v43 = vpop.f32.mrb[6].mxu0 }
 0x2f5   :  { %586 = vpow2.f32 %v461_v41  ;;  %v462_v44 = vmul.f32 -1.442695, %v399_v43  ;;  %v549_v45 = vpop.f32.mrb[7].mxu0 }
 0x2f7   :  { %588 = vpow2.f32 %v462_v44 }
 0x2ff   :  { %v587_v46 = vpop.eup %586 }
 0x300   :  { %v409_v47 = vadd.f32 1.0, %v587_v46 }
 0x301   :  { %v589_v48 = vpop.eup %588 }
 0x302   :  { %590 = vrcp.f32 %v409_v47  ;;  %v410_v49 = vadd.f32 1.0, %v589_v48 }
 0x304   :  { %592 = vrcp.f32 %v410_v49 }
 0x30c   :  { %v591_v50 = vpop.eup %590 }
 0x30d   :  { %415 = vst [vmem:[#allocation10] sm:$0xff] %v591_v50 }
 0x30e   :  { %v593_v51 = vpop.eup %592 }
 0x30f   :  { %416 = vst [vmem:[#allocation10 + $0x8] sm:$0xff] %v593_v51 }
 0x310   :  { %693 = shalt.err (!%p690_p8)
}
 0x311   :  { %s694_s13 = scalar_lea.hbm %s868_s4, 256 }
 0x312   :  { %p695_p9 = scmp.ne.s32.totalorder %s868_s4, %s694_s13  ;;  %p698_p10 = scmp.lt.u32.totalorder %s694_s13, %s868_s4 }
 0x314   :  { %p700_p11 = pnand %p698_p10, %p695_p9 }
 0x316   :  { %703 = shalt.err (!%p700_p11)
}
 0x317   :  { %s721_s19 = smov 128   ;;  %s722_s20 = smov 8  }
 0x318   :  { %428 = dma.vmem_to_hbm [thread:$0]  %s423_s27, 256, %s868_s4, [#allocation4], %s721_s19, %s721_s19, %s722_s20  }
 0x319   :  { %710 = dma.done.wait [#allocation4], 256  }
 0x31a   :  { %711 = vsyncadd [#allocation4], 4294967040 }
 0x31b   :  { %432 = vsyncpa [#allocation3], 1 }
 0x31c   :  { %433 = vsyncpa [#allocation6], 1 }
 0x31d   :  { %434 = vsyncpa [#allocation9], 1 }
 0x31e   :  { %435 = vsyncpa [#allocation4], 1 }

</bundles_post_ra>
